<compile_context>
chip_gen: v7x
topology: tpu7x:2x2x1
jax: 0.10.0
libtpu: 0.0.40
codegen_flags: <defaults>
</compile_context>

<pallas_src>
import math

import jax
import jax.numpy as jnp
from jax.experimental import pallas as pl
from jax.experimental.pallas import tpu as pltpu


def _round_up(x, m):
    return (x + m - 1) // m * m


# ---------------------------------------------------------------------------
# Kernel: one (CoutP, tm) output tile of Y = W @ X + b, single MXU pass.
# ---------------------------------------------------------------------------
def _conv1x1_kernel(x_ref, w_ref, b_ref, o_ref):
    # x_ref: (Cin, tm) f32    w_ref: (CoutP, Cin) f32    b_ref: (CoutP, 1) f32
    x = x_ref[...].astype(jnp.bfloat16)          # in-kernel cast (free filler)
    wm = w_ref[...].astype(jnp.bfloat16)
    acc = jnp.dot(wm, x, preferred_element_type=jnp.float32)   # (CoutP, tm)
    o_ref[...] = (acc + b_ref[...]).astype(o_ref.dtype)


# ---------------------------------------------------------------------------
# Wrapper: PyTorch-compatible 1x1 conv forward (NCHW in / NCHW out).
# ---------------------------------------------------------------------------
def conv1x1(x_nchw, weight, bias, *, tm=None):
    """y = Conv2d(kernel_size=1)(x).

    x_nchw : (N, Cin, H, W) float32
    weight : (Cout, Cin, 1, 1) float32   (PyTorch layout)
    bias   : (Cout,) float32
    returns: (N, Cout, H, W) float32
    """
    n, cin, h, w = x_nchw.shape
    cout = weight.shape[0]
    m = h * w

    # Pure reshape (no data movement): (N, Cin, H, W) -> (N, Cin, M).
    x_mat = x_nchw.reshape(n, cin, m)

    # Tile size along M: big tiles for HBM roofline, but keep >= 2 parallel
    # grid steps so both v7x TensorCores get work. Always a multiple of 128.
    if tm is None:
        mp128 = _round_up(m, 128)
        tm = min(512, mp128)
        if n * (-(-mp128 // tm)) < 2 and mp128 >= 256:
            tm = _round_up(mp128 // 2, 128)
    mp = _round_up(m, tm)
    cop = _round_up(cout, 8)          # Cout padded only to 8 sublanes (f32)

    x_p = jnp.pad(x_mat, ((0, 0), (0, 0), (0, mp - m)))
    w_p = jnp.pad(weight.reshape(cout, cin), ((0, cop - cout), (0, 0)))
    b_p = jnp.pad(bias, (0, cop - cout)).reshape(cop, 1)

    grid = (n, mp // tm)

    out = pl.pallas_call(
        _conv1x1_kernel,
        out_shape=jax.ShapeDtypeStruct((n, cop, mp), jnp.float32),
        grid=grid,
        in_specs=[
            # X panel: batch dim squeezed, full Cin, tm lanes.
            pl.BlockSpec((None, cin, tm), lambda b, i: (b, 0, i)),
            # Whole weight matrix, resident across the grid.
            pl.BlockSpec((cop, cin), lambda b, i: (0, 0)),
            # Bias as a (CoutP, 1) column.
            pl.BlockSpec((cop, 1), lambda b, i: (0, 0)),
        ],
        out_specs=pl.BlockSpec((None, cop, tm), lambda b, i: (b, 0, i)),
        compiler_params=pltpu.CompilerParams(
            dimension_semantics=("parallel", "parallel")),
    )(x_p, w_p, b_p)

    # Drop channel/spatial padding, restore NCHW (again a pure reshape).
    return out[:, :cout, :m].reshape(n, cout, h, w)


# ---------------------------------------------------------------------------
# Deterministic torch-like init + smoke test
# ---------------------------------------------------------------------------
def init_outconv_params(key, in_channels, out_channels):
    kw, kb = jax.random.split(key)
    bound = 1.0 / math.sqrt(in_channels)          # fan_in = Cin * 1 * 1
    weight = jax.random.uniform(kw, (out_channels, in_channels, 1, 1),
                                jnp.float32, -bound, bound)
    bias = jax.random.uniform(kb, (out_channels,), jnp.float32, -bound, bound)
    return weight, bias


if __name__ == "__main__":
    key = jax.random.PRNGKey(0)
    kx, kp = jax.random.split(key)

    # OutConv as used in a UNet head: 64 -> n_classes(=4), small spatial size.
    N, CIN, COUT, HW = 2, 64, 4, 16
    x = jax.random.normal(kx, (N, CIN, HW, HW), jnp.float32)
    weight, bias = init_outconv_params(kp, CIN, COUT)

    fwd = jax.jit(conv1x1)
    y = fwd(x, weight, bias)
    jax.block_until_ready(y)

    # Pure-JAX f32 reference for the 1x1 conv.
    ref = (jnp.einsum('nchw,oc->nohw', x, weight.reshape(COUT, CIN))
           + bias[None, :, None, None])

    assert y.shape == (N, COUT, HW, HW)
    assert bool(jnp.all(jnp.isfinite(y)))
    max_err = float(jnp.max(jnp.abs(y - ref)))
    assert max_err < 5e-2, f"max abs error {max_err}"   # bf16-operand tolerance
    print("KERNEL_OK")
</pallas_src>

<mosaic_0001>
module attributes {stable_mosaic.version = 11 : i64} {
  func.func @_conv1x1_kernel(%arg0: i32, %arg1: i32, %arg2: memref<1x64x256xf32, #tpu.memory_space<vmem>>, %arg3: memref<8x64xf32, #tpu.memory_space<vmem>>, %arg4: memref<8x1xf32, #tpu.memory_space<vmem>>, %arg5: memref<1x8x256xf32, #tpu.memory_space<vmem>>) attributes {dimension_semantics = [#tpu.dimension_semantics<parallel>, #tpu.dimension_semantics<parallel>], iteration_bounds = array<i64: 2, 1>, scalar_prefetch = 0 : i64, scratch_operands = 0 : i64, tpu.core_type = #tpu.core_type<tc>, window_params = [{transform_indices = @transform_0, window_bounds = array<i64: 1, 64, 256>}, {pipeline_mode = #tpu.pipeline_mode<synchronous>, transform_indices = @transform_1, window_bounds = array<i64: 8, 64>}, {pipeline_mode = #tpu.pipeline_mode<synchronous>, transform_indices = @transform_2, window_bounds = array<i64: 8, 1>}, {transform_indices = @transform_3, window_bounds = array<i64: 1, 8, 256>}]} {
    %c0 = arith.constant 0 : index
    %c0_0 = arith.constant 0 : index
    %c0_1 = arith.constant 0 : index
    %0 = vector.load %arg2[%c0, %c0_0, %c0_1] : memref<1x64x256xf32, #tpu.memory_space<vmem>>, vector<1x64x256xf32>
    %1 = vector.shape_cast %0 : vector<1x64x256xf32> to vector<64x256xf32>
    %2 = arith.truncf %1 : vector<64x256xf32> to vector<64x256xbf16>
    %c0_2 = arith.constant 0 : index
    %c0_3 = arith.constant 0 : index
    %3 = vector.load %arg3[%c0_2, %c0_3] : memref<8x64xf32, #tpu.memory_space<vmem>>, vector<8x64xf32>
    %4 = arith.truncf %3 : vector<8x64xf32> to vector<8x64xbf16>
    %cst = arith.constant dense<0.000000e+00> : vector<8x256xf32>
    %5 = tpu.matmul %4, %2, %cst {dimension_numbers = #tpu.dot_dimension_numbers<[1], [0], [0], [1], [0, 0, 1, 1], [], []>} : vector<8x64xbf16>, vector<64x256xbf16>, vector<8x256xf32> -> vector<8x256xf32>
    %c0_4 = arith.constant 0 : index
    %c0_5 = arith.constant 0 : index
    %6 = vector.load %arg4[%c0_4, %c0_5] : memref<8x1xf32, #tpu.memory_space<vmem>>, vector<8x1xf32>
    %7 = vector.broadcast %6 : vector<8x1xf32> to vector<8x256xf32>
    %8 = arith.addf %5, %7 : vector<8x256xf32>
    %c0_6 = arith.constant 0 : index
    %c0_7 = arith.constant 0 : index
    %c0_8 = arith.constant 0 : index
    %9 = vector.load %arg5[%c0_6, %c0_7, %c0_8] : memref<1x8x256xf32, #tpu.memory_space<vmem>>, vector<1x8x256xf32>
    %10 = vector.shape_cast %9 : vector<1x8x256xf32> to vector<8x256xf32>
    %11 = vector.shape_cast %8 : vector<8x256xf32> to vector<1x8x256xf32>
    tpu.vector_store %arg5[%c0_6, %c0_7, %c0_8], %11 {strides = array<i32>} : memref<1x8x256xf32, #tpu.memory_space<vmem>>, vector<1x8x256xf32>,
    return
  }
  func.func @transform_0(%arg0: i32, %arg1: i32) -> (i32, i32, i32) {
    %c0_i32 = arith.constant 0 : i32
    %c0_i32_0 = arith.constant 0 : i32
    return %arg0, %c0_i32, %arg1 : i32, i32, i32
  }
  func.func @transform_1(%arg0: i32, %arg1: i32) -> (i32, i32) {
    %c0_i32 = arith.constant 0 : i32
    %c0_i32_0 = arith.constant 0 : i32
    %c0_i32_1 = arith.constant 0 : i32
    return %c0_i32, %c0_i32_0 : i32, i32
  }
  func.func @transform_2(%arg0: i32, %arg1: i32) -> (i32, i32) {
    %c0_i32 = arith.constant 0 : i32
    %c0_i32_0 = arith.constant 0 : i32
    %c0_i32_1 = arith.constant 0 : i32
    return %c0_i32, %c0_i32_0 : i32, i32
  }
  func.func @transform_3(%arg0: i32, %arg1: i32) -> (i32, i32, i32) {
    %c0_i32 = arith.constant 0 : i32
    %c0_i32_0 = arith.constant 0 : i32
    return %arg0, %c0_i32, %arg1 : i32, i32, i32
  }
}

</mosaic_0001>

<bundles_post_ra>
// kernel: conv1x1.1
= control target key start
LH: loop header
LB: loop body
LE: loop exit
PB: predicated region body
PF: predicated region fallthrough
CT: control target
= control target key end

     0   :  { %s462_s12 = smov 0   ;;  %s464_s13 = smov 0   ;;  %s505_s0 = inlined_call_operand.vmem [shape: f32[2,64,256], index: 0, kind: input, shape index: {}]   ;;  %s506_s1 = inlined_call_operand.vmem [shape: f32[8,64], index: 1, kind: input, shape index: {}]   ;;  %s507_s2 = inlined_call_operand.vmem [shape: f32[8,1], index: 2, kind: input, shape index: {}]   ;;  %s508_s3 = inlined_call_operand.vmem [shape: f32[2,8,256], index: 3, kind: output, shape index: {}]  }
   0x1   :  { %s466_s14 = smov 0  }
   0x2 LB: > { %s25_s15 = sadd.s32 1, %s435_s13  ;;  %p381_p0 = scmp.ge.s32.totalorder %s439_s14, 1  ;;  %s439_s14 = sphi %s466_s14, %s13_s14   ;;  %s435_s13 = sphi %s464_s13, %s510_s13   ;;  %s431_s12 = sphi %s462_s12, %s509_s12  }
   0x3   : > { %p27_p1 = scmp.ge.s32.totalorder %s25_s15, 2  ;;  %p158_p2 = scmp.lt.s32.totalorder %s439_s14, 3 }
   0x5   : > { %s512_s15 = smov (%p27_p1, %s25_s15), 0  ;;  %p159_p3 = pnand %p381_p0, %p158_p2 }
   0x6   : > { %p191_p4 = scmp.lt.s32.totalorder (!%p159_p3), %s431_s12, 1  ;;  %v237_v0 = vld [vmem:[%s507_s2] sm:$0xff] (!%p159_p3)  ;;  %v441_v1 = vmov (!%p159_p3), 0   ;;  %vm243_vm0 = vcmask (!%p159_p3), 523264  }
   0x7   : > { %162 = sbr.rel (%p159_p3) target bundleno = 252 (0xfc), region = 32  ;;  %279 = vmatprep.mubr.bf16.mxu0 (!%p159_p3), %v441_v1  ;;  %416 = vset.pattern.permute.xlu0 (!%p159_p3), %v441_v1  ;;  %v235_v26 = vld [vmem:[%s506_s1] sm:$0xff] (!%p159_p3) }
   0x8   : > { %240 = vperm.xlu0 (!%p159_p3), %416, %v237_v0   ;;  %v236_v27 = vpack.c.bf16 (!%p159_p3), %v235_v26, %v235_v26 }
   0xe   : > { %s514_s12 = smov (!%p191_p4, %s431_s12), 1 }
   0xf   : > { %s389_s18 = sshll.u32 %s514_s12, 7  ;;  %s390_s24 = sshll.u32 %s514_s12, 4 }
  0x10   : > { %s198_s21 = scalar_lea.vmem %s505_s0, %s389_s18  ;;  %s208_s27 = scalar_lea.vmem %s508_s3, %s390_s24 }
  0x11   : > { %v212_v2 = vld [vmem:[%s198_s21 + $0x8] sm:$0xff]  ;;  %v214_v3 = vld [vmem:[%s198_s21 + $0x18] sm:$0xff]  ;;  %v211_v4 = vld [vmem:[%s198_s21] sm:$0xff] }
  0x12   : > { %v228_v5 = vpack.c.bf16 %v214_v3, %v212_v2  ;;  %v213_v6 = vld [vmem:[%s198_s21 + $0x10] sm:$0xff]  ;;  %v216_v7 = vld [vmem:[%s198_s21 + $0x28] sm:$0xff]  ;;  %v218_v8 = vld [vmem:[%s198_s21 + $0x38] sm:$0xff] }
  0x13   : > { %v227_v9 = vpack.c.bf16 %v213_v6, %v211_v4  ;;  %v230_v10 = vpack.c.bf16 %v218_v8, %v216_v7  ;;  %v215_v11 = vld [vmem:[%s198_s21 + $0x20] sm:$0xff]  ;;  %v217_v12 = vld [vmem:[%s198_s21 + $0x30] sm:$0xff]  ;;  %v220_v13 = vld [vmem:[%s198_s21 + $0x48] sm:$0xff] }
  0x14   : > { %247 = vmatprep.subr.bf16.mxu0 %v228_v5  ;;  %v222_v14 = vld [vmem:[%s198_s21 + $0x58] sm:$0xff]  ;;  %v229_v15 = vpack.c.bf16 %v217_v12, %v215_v11  ;;  %v219_v17 = vld [vmem:[%s198_s21 + $0x40] sm:$0xff]  ;;  %v221_v18 = vld [vmem:[%s198_s21 + $0x50] sm:$0xff] }
  0x15   : > { %248 = vmatpush1.bf16.msra.mxu0 %v227_v9  ;;  %v232_v16 = vpack.c.bf16 %v222_v14, %v220_v13  ;;  %v224_v19 = vld [vmem:[%s198_s21 + $0x68] sm:$0xff]  ;;  %v226_v20 = vld [vmem:[%s198_s21 + $0x78] sm:$0xff]  ;;  %v231_v21 = vpack.c.bf16 %v221_v18, %v219_v17  ;;  %v223_v23 = vld [vmem:[%s198_s21 + $0x60] sm:$0xff] }
  0x16   : > { %249 = vmatprep.subr.bf16.mxu0 %v230_v10  ;;  %v234_v22 = vpack.c.bf16 %v226_v20, %v224_v19  ;;  %v225_v24 = vld [vmem:[%s198_s21 + $0x70] sm:$0xff] }
  0x17   : > { %v233_v25 = vpack.c.bf16 %v225_v24, %v223_v23 }
  0x19   : > { %250 = vmatpush1.bf16.msra.mxu0 %v229_v15 }
  0x1a   : > { %251 = vmatprep.subr.bf16.mxu0 %v232_v16 }
  0x1d   : > { %252 = vmatpush1.bf16.msra.mxu0 %v231_v21 }
  0x1e   : > { %253 = vmatprep.subr.bf16.mxu0 %v234_v22 }
  0x21   : > { %254 = vmatpush1.bf16.msra.mxu0 %v233_v25 }
  0x24   : > { %386 = vmatmul.mubr.msk.bf16.vlgmr.msra.gmra.mrb[0].mxu0 %vm243_vm0, %v236_v27 }
  0x87   : > { %v241_v28 = vpop.permute.xlu0 %240 }
  0xf7   : > { %v281_v29 = vpop.f32.mrb[0].mxu0 }
  0xf8   : > { %v282_v30 = vadd.f32 %v281_v29, %v241_v28  ;;  %v283_v31 = vpop.f32.mrb[1].mxu0 }
  0xf9   : > { %v284_v32 = vadd.f32 %v283_v31, %v241_v28  ;;  %v285_v33 = vpop.f32.mrb[2].mxu0 }
  0xfa   : > { %288 = vst [vmem:[%s208_s27] sm:$0xff] %v282_v30  ;;  %v286_v34 = vpop.f32.mrb[3].mxu0 }
  0xfb   : > { %289 = vst [vmem:[%s208_s27 + $0x8] sm:$0xff] %v284_v32 }
  0xfc PF: > { %s13_s14 = sadd.s32 1, %s439_s14   ;;  %s509_s12 = smov %s435_s13 }
  0xfd   : > { %p10_p5 = scmp.ge.s32.totalorder %s13_s14, 4   ;;  %s510_s13 = smov %s512_s15 }
  0xff   :  { %12 = sbr.rel (!%p10_p5) target bundleno = 2 (0x2), region = 62 }

</bundles_post_ra>
